<compile_context>
chip_gen: v7x
topology: tpu7x:2x2x1
jax: 0.10.0
libtpu: 0.0.40
codegen_flags: <defaults>
</compile_context>

<pallas_src>
import jax
import jax.numpy as jnp
from jax.experimental import pallas as pl
from jax.experimental.pallas import tpu as pltpu


def _round_up(x, m):
    return ((x + m - 1) // m) * m


def _edge_feature_mask_kernel(keep_ref, ea_ref, out_ref):
    # keep_ref : (1, bc) int32 column keep-mask tile (1 = keep, 0 = drop)
    # ea_ref / out_ref : (br, bc) tile of edge_attr
    out_ref[...] = jnp.where(keep_ref[...] != 0, ea_ref[...],
                             jnp.array(0, dtype=ea_ref.dtype))


def _pick_blocks(n, d, itemsize, target_bytes=4 * 1024 * 1024):
    """(block_rows, block_cols): ~target_bytes per block, (8,128)-aligned,
    total block bytes bounded even for very wide d, and >=~4 row tiles when n
    allows so v7x's two TensorCores both get 'parallel' grid work."""
    # Column blocking only when one 8-sublane stripe of the full feature
    # width would already exceed the byte budget (very wide d).
    if 8 * d * itemsize <= target_bytes:
        bc = d
    else:
        bc = max(128, (target_bytes // (8 * itemsize)) // 128 * 128)
        bc = min(bc, _round_up(d, 128))
    br = max(8, (target_bytes // max(1, bc * itemsize)) // 8 * 8)
    br = min(br, _round_up(n, 8))
    if n > 32:  # keep multiple row tiles for megacore sharding on v7x
        br = min(br, max(8, _round_up(pl.cdiv(n, 4), 8)))
    return br, bc


def _masked_stream(ea, keep):
    """out[i, j] = ea[i, j] if keep[0, j] else 0 — HBM-bandwidth streaming."""
    n, d = ea.shape
    br, bc = _pick_blocks(n, d, ea.dtype.itemsize)
    grid = (pl.cdiv(n, br), pl.cdiv(d, bc))
    bytes_accessed = 2 * n * d * ea.dtype.itemsize + keep.size * keep.dtype.itemsize
    return pl.pallas_call(
        _edge_feature_mask_kernel,
        out_shape=jax.ShapeDtypeStruct((n, d), ea.dtype),
        grid=grid,
        in_specs=[
            pl.BlockSpec((1, bc), lambda i, j: (0, j)),     # keep-mask tile
            pl.BlockSpec((br, bc), lambda i, j: (i, j)),    # edge_attr tile
        ],
        out_specs=pl.BlockSpec((br, bc), lambda i, j: (i, j)),
        input_output_aliases={1: 0},                        # alias edge_attr -> out
        cost_estimate=pl.CostEstimate(flops=n * d, transcendentals=0,
                                      bytes_accessed=bytes_accessed),
        compiler_params=pltpu.CompilerParams(
            dimension_semantics=("parallel", "parallel"),
            vmem_limit_bytes=32 * 1024 * 1024),
    )(keep, ea)


def edge_feature_masking_pallas(edge_attr, seed, p=0.15):
    n, d = edge_attr.shape

    # One Bernoulli(p) draw per column (torch: u < p drops => keep where u >= p).
    key = jax.random.PRNGKey(seed)
    u = jax.random.uniform(key, (1, d), dtype=jnp.float32)
    keep = (u >= jnp.float32(p)).astype(jnp.int32)

    # Lane-dense repack when the feature dim is narrower than one 128-lane
    # vreg: present a (., 128) slab so stores are full (unmasked) vst's.
    if 0 < d < 128 and 128 % d == 0 and n > 0:
        reps = 128 // d
        n_pad = _round_up(n, reps)
        ea = edge_attr if n_pad == n else jnp.pad(
            edge_attr, ((0, n_pad - n), (0, 0)))
        slab = ea.reshape(n_pad * d // 128, 128)
        out = _masked_stream(slab, jnp.tile(keep, (1, reps)))
        return out.reshape(n_pad, d)[:n]

    return _masked_stream(edge_attr, keep)


def edge_feature_masking(data, seed, p=0.15):
    """Forward pass of EdgeFeatureMasking on a Data-like dict."""
    # TODO(synk): torch_geometric Data container is emulated with a plain dict.
    new_edge_attr = edge_feature_masking_pallas(data["edge_attr"], seed, p=p)
    return {
        "x": data["x"],
        "y": data["y"],
        "edge_index": data["edge_index"],
        "train_mask": data["train_mask"],
        "test_mask": data["test_mask"],
        "edge_attr": new_edge_attr,
    }


if __name__ == "__main__":
    key = jax.random.PRNGKey(0)
    k_x, k_y, k_ei, k_ea, k_ea2 = jax.random.split(key, 5)

    num_nodes, node_dim = 16, 8
    num_edges, edge_dim = 64, 128   # (n, d) for edge_attr

    data = {
        "x": jax.random.normal(k_x, (num_nodes, node_dim), dtype=jnp.float32),
        "y": jax.random.randint(k_y, (num_nodes,), 0, 4, dtype=jnp.int32),
        "edge_index": jax.random.randint(
            k_ei, (2, num_edges), 0, num_nodes, dtype=jnp.int32),
        "edge_attr": jax.random.normal(
            k_ea, (num_edges, edge_dim), dtype=jnp.float32),
        "train_mask": jnp.arange(num_nodes) < num_nodes // 2,
        "test_mask": jnp.arange(num_nodes) >= num_nodes // 2,
    }

    out = edge_feature_masking(data, seed=0, p=0.15)
    jax.block_until_ready(out["edge_attr"])

    ea_in = data["edge_attr"]
    ea_out = out["edge_attr"]
    assert ea_out.shape == ea_in.shape and ea_out.dtype == ea_in.dtype

    # Every column must be either fully dropped or left bit-exact.
    col_zero = jnp.all(ea_out == 0.0, axis=0)
    col_same = jnp.all(ea_out == ea_in, axis=0)
    assert bool(jnp.all(col_zero | col_same)), "columns must be dropped or intact"

    # Exact match against the reference masking (same wrapper-side PRNG draw).
    ref_keep = jax.random.uniform(jax.random.PRNGKey(0), (1, edge_dim),
                                  dtype=jnp.float32) >= jnp.float32(0.15)
    ref_out = jnp.where(ref_keep, ea_in, 0.0)
    assert bool(jnp.all(ea_out == ref_out)), "kernel must match reference masking"

    # Pass-through fields untouched.
    assert out["x"] is data["x"] and out["y"] is data["y"]
    assert out["edge_index"] is data["edge_index"]

    # Narrow-feature path (lane-dense repack), ragged edge count.
    n2, d2 = 50, 16
    ea2 = jax.random.normal(k_ea2, (n2, d2), dtype=jnp.float32)
    out2 = edge_feature_masking_pallas(ea2, seed=1, p=0.5)
    jax.block_until_ready(out2)
    ref_keep2 = jax.random.uniform(jax.random.PRNGKey(1), (1, d2),
                                   dtype=jnp.float32) >= jnp.float32(0.5)
    ref_out2 = jnp.where(ref_keep2, ea2, 0.0)
    assert out2.shape == (n2, d2)
    assert bool(jnp.all(out2 == ref_out2)), "repacked path must match reference"

    print("KERNEL_OK")
</pallas_src>

<mosaic_0001>
module attributes {stable_mosaic.version = 11 : i64} {
  func.func @_edge_feature_mask_kernel(%arg0: i32, %arg1: i32, %arg2: memref<1x128xi32, #tpu.memory_space<vmem>>, %arg3: memref<16x128xf32, #tpu.memory_space<vmem>>, %arg4: memref<16x128xf32, #tpu.memory_space<vmem>>) attributes {dimension_semantics = [#tpu.dimension_semantics<parallel>, #tpu.dimension_semantics<parallel>], iteration_bounds = array<i64: 4, 1>, scalar_prefetch = 0 : i64, scratch_operands = 0 : i64, tpu.core_type = #tpu.core_type<tc>, window_params = [{transform_indices = @transform_0, window_bounds = array<i64: 1, 128>}, {transform_indices = @transform_1, window_bounds = array<i64: 16, 128>}, {transform_indices = @transform_2, window_bounds = array<i64: 16, 128>}]} {
    %c0 = arith.constant 0 : index
    %c0_0 = arith.constant 0 : index
    %0 = vector.load %arg2[%c0, %c0_0] : memref<1x128xi32, #tpu.memory_space<vmem>>, vector<1x128xi32>
    %c0_i32 = arith.constant 0 : i32
    %1 = vector.broadcast %c0_i32 : i32 to vector<1x128xi32>
    %2 = arith.cmpi ne, %0, %1 : vector<1x128xi32>
    %c0_1 = arith.constant 0 : index
    %c0_2 = arith.constant 0 : index
    %3 = vector.load %arg3[%c0_1, %c0_2] : memref<16x128xf32, #tpu.memory_space<vmem>>, vector<16x128xf32>
    %cst = arith.constant 0.000000e+00 : f32
    %4 = vector.shape_cast %2 : vector<1x128xi1> to vector<1x128xi1>
    %5 = vector.broadcast %4 : vector<1x128xi1> to vector<16x128xi1>
    %6 = vector.broadcast %cst : f32 to vector<16x128xf32>
    %7 = arith.select %5, %3, %6 : vector<16x128xi1>, vector<16x128xf32>
    %c0_3 = arith.constant 0 : index
    %c0_4 = arith.constant 0 : index
    %8 = vector.load %arg4[%c0_3, %c0_4] : memref<16x128xf32, #tpu.memory_space<vmem>>, vector<16x128xf32>
    tpu.vector_store %arg4[%c0_3, %c0_4], %7 {strides = array<i32>} : memref<16x128xf32, #tpu.memory_space<vmem>>, vector<16x128xf32>,
    return
  }
  func.func @transform_0(%arg0: i32, %arg1: i32) -> (i32, i32) {
    %c0_i32 = arith.constant 0 : i32
    %c0_i32_0 = arith.constant 0 : i32
    return %c0_i32, %arg1 : i32, i32
  }
  func.func @transform_1(%arg0: i32, %arg1: i32) -> (i32, i32) {
    %c0_i32 = arith.constant 0 : i32
    return %arg0, %arg1 : i32, i32
  }
  func.func @transform_2(%arg0: i32, %arg1: i32) -> (i32, i32) {
    %c0_i32 = arith.constant 0 : i32
    return %arg0, %arg1 : i32, i32
  }
}

</mosaic_0001>

<bundles_post_ra>
// kernel: tpu_custom_call.1
= control target key start
LH: loop header
LB: loop body
LE: loop exit
PB: predicated region body
PF: predicated region fallthrough
CT: control target
= control target key end

     0   :  { %7 = vsyncpa [#allocation3], 0  ;;  %s718_s0 = inlined_call_operand.vmem [shape: s32[1,128], index: 0, kind: input, shape index: {}]   ;;  %s719_s1 = inlined_call_operand.hbm [shape: f32[64,128], index: 1, kind: input, shape index: {}, may-alias: {1,2}]   ;;  %s720_s2 = inlined_call_operand.hbm [shape: f32[64,128], index: 2, kind: output, shape index: {}, may-alias: {1,2}]  }
   0x1   :  { %9 = vsyncpa [#allocation3 + $0x1], 0 }
   0x2   :  { %10 = vsyncpa [#allocation4], 0 }
   0x3   :  { %12 = vsyncpa [#allocation4 + $0x1], 0  ;;  %s542_s9 = smov 0   ;;  %s544_s10 = smov 0  }
   0x4   :  { %s546_s11 = smov 0   ;;  %s548_s12 = smov 0  }
   0x5   :  { %s550_s13 = smov 0   ;;  %s552_s14 = smov 0  }
   0x6 LB: > { %s321_s15 = sadd.s32 4294967295, %s518_s14   ;;  %s322_s16 = sadd.s32 4294967294, %s518_s14   ;;  %s518_s14 = sphi %s552_s14, %s18_s14   ;;  %s514_s13 = sphi %s550_s13, %s734_s13   ;;  %s510_s12 = sphi %s548_s12, %s733_s12   ;;  %s506_s11 = sphi %s546_s11, %s732_s11   ;;  %s502_s10 = sphi %s544_s10, %s731_s10   ;;  %s498_s9 = sphi %s542_s9, %s730_s9  }
   0x7   : > { %s30_s17 = sadd.s32 1, %s514_s13  ;;  %s65_s18 = sadd.s32 1, %s506_s11 }
   0x8   : > { %p32_p0 = scmp.ge.s32.totalorder %s30_s17, 4  ;;  %p72_p1 = scmp.ne.s32.totalorder %s506_s11, %s502_s10 }
   0x9   : > { %p73_p2 = scmp.eq.s32.totalorder %s518_s14, 0  ;;  %p78_p3 = scmp.ne.s32.totalorder %s502_s10, %s498_s9 }
   0xa   : > { %s736_s17 = smov (%p32_p0, %s30_s17), 0  ;;  %p79_p5 = scmp.eq.s32.totalorder %s321_s15, 0 }
   0xb   : > { %p583_p4 = por %p73_p2, %p72_p1  ;;  %s60_s20 = ssub.s32 %s514_s13, %s736_s17 }
   0xc   : > { %p104_p6 = scmp.eq.s32.totalorder %s321_s15, 3  ;;  %p63_p7 = scmp.eq.s32.totalorder %s60_s20, 0 }
   0xd   : > { %p589_p8 = por %p79_p5, %p78_p3  ;;  %p110_p10 = scmp.eq.s32.totalorder %s322_s16, 3 }
   0xe   : > { %p593_p9 = por %p104_p6, %p72_p1  ;;  %p351_p12 = scmp.lt.s32.totalorder %s518_s14, 4 }
   0xf   : > { %s598_s23 = scalar_select %p63_p7, %s506_s11, %s65_s18  }
  0x10   : > { %s724_s22 = scalar_select %p593_p9, 1, 0 }
  0x11   : > { %p600_p11 = por %p110_p10, %p78_p3  ;;  %s136_s25 = sand.u32 1, %s506_s11  }
  0x12   : > { %s326_s26 = sshll.u32 %s136_s25, 4  ;;  %s337_s27 = sshll.u32 %s514_s13, 8 }
  0x13   : > { %s725_s24 = scalar_select %p600_p11, 1, 0 }
  0x14   : > { %s610_s30 = scalar_lea.hbm %s719_s1, %s337_s27  ;;  %s140_s3 = scalar_lea.vmem [#allocation2], %s326_s26 }
  0x15   : > { %s148_s4 = sshll.u32 %s140_s3, 4  ;;  %p616_p13 = pnand %p351_p12, %p583_p4  ;;  %s612_s4 = int_to_ptr.vmem [resolvable:$true] %s148_s4 }
  0x16   : > { %s621_s6 = scalar_lea.sflag [#allocation3], %s136_s25  ;;  %s406_s7 = scalar_lea.hbm %s610_s30, 256 }
  0x17   : > { %p407_p1 = scmp.ne.s32.totalorder %s610_s30, %s406_s7  ;;  %p408_p2 = pneg %p616_p13 }
  0x18   : > { %s411_s16 = scalar_lea.hbm %s719_s1, 1024  ;;  %p412_p4 = scmp.lt.u32.totalorder %s610_s30, %s719_s1 }
  0x19   : > { %p409_p3 = pnand %p408_p2, %p407_p1  ;;  %p413_p6 = scmp.lt.u32.totalorder %s411_s16, %s406_s7 }
  0x1a   : > { %p415_p10 = scmp.lt.u32.totalorder %s406_s7, %s610_s30 }
  0x1b   : > { %p410_p5 = pneg %p409_p3  ;;  %p414_p7 = por %p413_p6, %p412_p4 }
  0x1d   : > { %p416_p12 = por %p415_p10, %p414_p7 }
  0x1f   : > { %p417_p0 = pnand %p416_p12, %p410_p5 }
  0x21   : > { %420 = shalt.err (!%p417_p0)
}
  0x22   : > { %s421_s20 = scalar_lea.vmem %s612_s4, 256  ;;  %s520_s25 = smov [#allocation2]  }
  0x23   : > { %p422_p1 = scmp.ne.s32.totalorder %s612_s4, %s421_s20  ;;  %s426_s26 = sshll.u32 %s520_s25, 4  ;;  %s427_s26 = int_to_ptr.vmem [resolvable:$false] %s426_s26 }
  0x24   : > { %s428_s27 = scalar_lea.vmem %s427_s26, 512  ;;  %p429_p9 = scmp.lt.s32.totalorder %s612_s4, %s427_s26 }
  0x25   : > { %p424_p3 = pnand %p422_p1, %p408_p2  ;;  %p430_p4 = scmp.lt.s32.totalorder %s428_s27, %s421_s20 }
  0x27   : > { %p425_p11 = pneg %p424_p3  ;;  %p431_p6 = por %p430_p4, %p429_p9 }
  0x29   : > { %p432_p7 = pnand %p431_p6, %p425_p11 }
  0x2b   : > { %435 = shalt.err (!%p432_p7)
}
  0x2c   : > { %s521_s28 = smov 128   ;;  %s522_s29 = smov 8  }
  0x2d   : > { %346 = dma.hbm_to_vmem [thread:$0]  (!%p616_p13), %s610_s30, 256, %s612_s4, %s621_s6, %s521_s28, %s521_s28, %s522_s29  }
  0x2e   : > { %p156_p0 = scmp.lt.s32.totalorder %s518_s14, 5  ;;  %p727_p2 = scmp.ge.s32.totalorder %s518_s14, 1 }
  0x30   : > { %p157_p5 = pnand %p727_p2, %p156_p0 }
  0x31   : > { %s653_s3 = sand.u32 (!%p157_p5), 1, %s502_s10  }
  0x32   : > { %160 = sbr.rel (%p157_p5) target bundleno = 85 (0x55), region = 28  ;;  %s330_s7 = sshll.u32 (!%p157_p5), %s653_s3, 4 }
  0x33   : > { %s163_s8 = scalar_lea.sflag (!%p157_p5), [#allocation3], %s653_s3  ;;  %s166_s15 = scalar_lea.vmem (!%p157_p5), [#allocation2], %s330_s7 }
  0x39   : > { %489 = dma.done.wait (%p589_p8), %s163_s8, 256  }
  0x3a   : > { %491 = vsyncadd (%p589_p8), %s163_s8, 4294967040  ;;  %v200_v0 = vlaneseq  ;;  %v195_v3 = vld [vmem:[%s718_s0] sm:$0x1]  ;;  %s189_s5 = scalar_lea.vmem [#allocation5], %s330_s7  ;;  %s338_s16 = sshll.u32 %s510_s12, 8  ;;  %v523_v4 = vmov 0  }
  0x3b   : > { %vm196_vm0 = vcmp.ne.s32.totalorder %v195_v3, 0  ;;  %s224_s6 = sshll.u32 %s189_s5, 4  ;;  %v197_v6 = vld [vmem:[%s166_s15] sm:$0xff]  ;;  %v198_v8 = vld [vmem:[%s166_s15 + $0x8] sm:$0xff]  ;;  %s670_s19 = scalar_lea.hbm %s720_s2, %s338_s16  ;;  %s665_s6 = int_to_ptr.vmem [resolvable:$true] %s224_s6 }
  0x3c   : > { %v201_v1 = vshrl.u32 %v200_v0, 7  ;;  %v199_v5 = vsel %vm196_vm0, 1, %v523_v4  ;;  %s210_s12 = scalar_lea.sflag [#allocation4], %s653_s3  ;;  %s436_s20 = scalar_lea.vmem %s665_s6, 256 }
  0x3d   : > { %p437_p8 = scmp.ne.s32.totalorder %s665_s6, %s436_s20  ;;  %p728_p9 = scmp.ne.s32.totalorder %s724_s22, 0 }
  0x3e   : > { %v202_v2 = vsub.s32 0, %v201_v1  ;;  %s524_s25 = smov [#allocation5]  }
  0x3f   : > { %p438_p11 = pnand %p437_p8, %p728_p9  ;;  %s440_s26 = sshll.u32 %s524_s25, 4  ;;  %s441_s26 = int_to_ptr.vmem [resolvable:$false] %s440_s26 }
  0x40   : > { %v203_v7 = vrot.slane %v199_v5, %v202_v2  ;;  %s442_s27 = scalar_lea.vmem %s441_s26, 512  ;;  %p443_p10 = scmp.lt.s32.totalorder %s665_s6, %s441_s26 }
  0x41   : > { %p439_p13 = pneg %p438_p11  ;;  %p444_p12 = scmp.lt.s32.totalorder %s442_s27, %s436_s20 }
  0x42   : > { %vm204_vm1 = vcmp.eq.s32.totalorder %v203_v7, 1 }
  0x43   : > { %v205_v9 = vsel %vm204_vm1, %v197_v6, 0.0  ;;  %v206_v10 = vsel %vm204_vm1, %v198_v8, 0.0  ;;  %p445_p1 = por %p444_p12, %p443_p10 }
  0x44   : > { %207 = vst [vmem:[%s189_s5] sm:$0xff] %v205_v9  ;;  %208 = vst [vmem:[%s189_s5 + $0x8] sm:$0xff] %v206_v10 }
  0x45   : > { %p446_p3 = pnand %p445_p1, %p439_p13 }
  0x47   : > { %449 = shalt.err (!%p446_p3)
}
  0x48   : > { %s450_s28 = scalar_lea.hbm %s670_s19, 256  ;;  %s454_s8 = scalar_lea.hbm %s720_s2, 1024 }
  0x49   : > { %p451_p4 = scmp.ne.s32.totalorder %s670_s19, %s450_s28  ;;  %p455_p0 = scmp.lt.u32.totalorder %s670_s19, %s720_s2 }
  0x4a   : > { %p456_p2 = scmp.lt.u32.totalorder %s454_s8, %s450_s28  ;;  %p458_p8 = scmp.lt.u32.totalorder %s450_s28, %s670_s19 }
  0x4b   : > { %p452_p6 = pnand %p451_p4, %p728_p9 }
  0x4c   : > { %p457_p5 = por %p456_p2, %p455_p0 }
  0x4d   : > { %p453_p7 = pneg %p452_p6 }
  0x4e   : > { %p459_p11 = por %p458_p8, %p457_p5 }
  0x50   : > { %p460_p13 = pnand %p459_p11, %p453_p7 }
  0x52   : > { %463 = shalt.err (!%p460_p13)
}
  0x53   : > { %s525_s4 = smov 128   ;;  %s526_s5 = smov 8  }
  0x54   : > { %341 = dma.vmem_to_hbm [thread:$0]  (%p728_p9), %s665_s6, 256, %s670_s19, %s210_s12, %s525_s4, %s525_s4, %s526_s5  }
  0x55 PF: > { %p352_p10 = scmp.ge.s32.totalorder %s518_s14, 2  ;;  %s239_s16 = sand.u32 1, %s498_s9  }
  0x56   : > { %p729_p12 = scmp.ne.s32.totalorder %s725_s24, 0  ;;  %s240_s21 = scalar_lea.sflag [#allocation4], %s239_s16 }
  0x58   : > { %p348_p1 = pnand %p352_p10, %p729_p12 }
  0x5a   : > { %493 = dma.done.wait (!%p348_p1), %s240_s21, 256  }
  0x5b   : > { %495 = vsyncadd (!%p348_p1), %s240_s21, 4294967040  ;;  %s18_s14 = sadd.s32 1, %s518_s14   ;;  %s730_s9 = smov %s502_s10 }
  0x5c   : > { %p15_p3 = scmp.ge.s32.totalorder %s18_s14, 6   ;;  %s731_s10 = smov %s506_s11 }
  0x5d   : > { %s732_s11 = smov %s598_s23  ;;  %s733_s12 = smov %s514_s13 }
  0x5e   : > { %s734_s13 = smov %s736_s17  ;;  %17 = sbr.rel (!%p15_p3) target bundleno = 6 (0x6), region = 76 }
  0x65   :  { %245 = vsyncpa [#allocation3], 1 }
  0x66   :  { %247 = vsyncpa [#allocation3 + $0x1], 1 }
  0x67   :  { %248 = vsyncpa [#allocation4], 1 }
  0x68   :  { %250 = vsyncpa [#allocation4 + $0x1], 1 }

</bundles_post_ra>
